<compile_context>
chip_gen: v7x
topology: tpu7x:2x2x1
jax: 0.10.0
libtpu: 0.0.40
codegen_flags: <defaults>
</compile_context>

<pallas_src>
import functools

import jax
import jax.numpy as jnp
from jax.experimental import pallas as pl
from jax.experimental.pallas import tpu as pltpu

INPUT_SIZE = 10
HIDDEN = 20
OUT_FEATURES = 2

INPUT_PAD = 16           # padded input feature dim (multiple of 8 sublanes)
HIDDEN_PAD = 32          # padded hidden dim -> 4*HIDDEN_PAD = 128 lanes
LANES = 4 * HIDDEN_PAD   # 128
BATCH_PAD = 8            # padded batch (full sublane tile)

W_ROWS = INPUT_PAD + HIDDEN_PAD + 8   # wih rows | whh rows | bias row (+pad)
FC_ROWS = HIDDEN_PAD + 8              # wfc rows | bfc | s | a | b (+pad)


def _lstm_fc_kernel(x_ref, w_ref, fc_ref, out_ref, *, seq_len):
    """Full LSTM recurrence + final Linear in one kernel invocation.

    x_ref  : (T*8, 16)   time-major, batch padded to 8 rows per step, zeros pad
    w_ref  : (56, 128)   rows [0:16]=W_ih^T, [16:48]=W_hh^T, [48]=b_ih+b_hh
                         gate lane blocks of 32: [i | f | g | o], valid 20 each
    fc_ref : (40, 128)   rows [0:32]=W_fc^T (cols 0..1 valid), [32]=b_fc,
                         [33]=s, [34]=a, [35]=b (per-lane activation constants)
    out_ref: (8, 128)    valid region [0:B, 0:2]
    """
    f32 = jnp.float32
    IP, HP, BP = INPUT_PAD, HIDDEN_PAD, BATCH_PAD

    wih = w_ref[0:IP, :]                    # (16, 128)  loop-invariant
    whh = w_ref[IP:IP + HP, :]              # (32, 128)  loop-invariant
    bias = w_ref[IP + HP:IP + HP + 1, :]    # (1, 128)

    wfc = fc_ref[0:HP, :]                   # (32, 128)
    bfc = fc_ref[HP:HP + 1, :]              # (1, 128)

    # Per-lane activation constants, hoisted + pre-broadcast (no per-iter
    # broadcast_in_dim: JAX does not CSE broadcasts inside the unrolled loop).
    s_b = jnp.broadcast_to(fc_ref[HP + 1:HP + 2, :], (BP, LANES))
    a_b = jnp.broadcast_to(fc_ref[HP + 2:HP + 3, :], (BP, LANES))
    b_b = jnp.broadcast_to(fc_ref[HP + 3:HP + 4, :], (BP, LANES))

    # Hoisted input projection + bias: ONE GEMM, off the serial critical path.
    gates_x = (jnp.dot(x_ref[...], wih, preferred_element_type=f32)
               + bias)                       # (T*8, 128)

    h = jnp.zeros((BP, HP), f32)
    c = jnp.zeros((BP, HP), f32)

    # Fully unrolled recurrence (seq_len is static and small).
    for t in range(seq_len):
        # One aligned MXU pass per step: (8,32) x (32,128) -> (8,128).
        pre = gates_x[t * BP:(t + 1) * BP, :] + jnp.dot(
            h, whh, preferred_element_type=f32)

        # Single EUP tanh for all four gates:
        #   i/f/o lanes: sigmoid(x) = 0.5*tanh(0.5x) + 0.5   (s=a=b=0.5)
        #   g lanes    : tanh(x)                              (s=a=1, b=0)
        act = jnp.tanh(pre * s_b)
        gates = act * a_b + b_b

        i_g = gates[:, 0 * HP:1 * HP]
        f_g = gates[:, 1 * HP:2 * HP]
        g_g = gates[:, 2 * HP:3 * HP]
        o_g = gates[:, 3 * HP:4 * HP]

        c = f_g * c + i_g * g_g
        h = o_g * jnp.tanh(c)

    # Final Linear, lane-dense (8,128) store; padded cols/rows are exact zeros.
    out_ref[...] = jnp.dot(h, wfc, preferred_element_type=f32) + bfc


@jax.jit
def simple_rnn_forward(x, w_slab, fc_slab):
    """x: (B, T, I) float32, batch_first — same contract as the PyTorch module."""
    B, T, I = x.shape

    # Tiny prep fused into the jitted graph: time-major, pad batch->8 and
    # features->16 so every in-kernel per-step access is an 8-aligned full tile.
    x_tm = jnp.transpose(x, (1, 0, 2)).astype(jnp.float32)          # (T, B, I)
    x_pad = jnp.zeros((T, BATCH_PAD, INPUT_PAD), jnp.float32)
    x_pad = x_pad.at[:, :B, :I].set(x_tm).reshape(T * BATCH_PAD, INPUT_PAD)

    kernel = functools.partial(_lstm_fc_kernel, seq_len=T)
    vmem_spec = pl.BlockSpec(memory_space=pltpu.MemorySpace.VMEM)

    out_pad = pl.pallas_call(
        kernel,
        out_shape=jax.ShapeDtypeStruct((BATCH_PAD, LANES), jnp.float32),
        in_specs=[vmem_spec] * 3,
        out_specs=vmem_spec,
    )(x_pad, w_slab, fc_slab)

    return out_pad[:B, :OUT_FEATURES]


def init_params(key):
    """Deterministic init mimicking PyTorch's uniform(-1/sqrt(H), 1/sqrt(H))."""
    H, HP, IP = HIDDEN, HIDDEN_PAD, INPUT_PAD
    k = 1.0 / jnp.sqrt(jnp.float32(H))
    keys = jax.random.split(key, 6)
    # PyTorch-shaped raw parameters (gate rows stacked in order [i, f, g, o]).
    w_ih = jax.random.uniform(keys[0], (4 * H, INPUT_SIZE), jnp.float32, -k, k)
    w_hh = jax.random.uniform(keys[1], (4 * H, H), jnp.float32, -k, k)
    b_ih = jax.random.uniform(keys[2], (4 * H,), jnp.float32, -k, k)
    b_hh = jax.random.uniform(keys[3], (4 * H,), jnp.float32, -k, k)
    w_fc = jax.random.uniform(keys[4], (OUT_FEATURES, H), jnp.float32, -k, k)
    b_fc = jax.random.uniform(keys[5], (OUT_FEATURES,), jnp.float32, -k, k)

    raw = dict(w_ih=w_ih, w_hh=w_hh, b_ih=b_ih, b_hh=b_hh, w_fc=w_fc, b_fc=b_fc)

    # --- Pack everything into two lane-dense (…,128) slabs, zero-padded. ---
    wih_t, whh_t, bias = w_ih.T, w_hh.T, b_ih + b_hh   # (I,4H), (H,4H), (4H,)

    wih_pad = jnp.zeros((IP, LANES), jnp.float32)
    whh_pad = jnp.zeros((HP, LANES), jnp.float32)
    b_pad = jnp.zeros((LANES,), jnp.float32)
    for g in range(4):                      # scatter each gate into its 32-lane block
        wih_pad = wih_pad.at[:INPUT_SIZE, g * HP:g * HP + H].set(wih_t[:, g * H:(g + 1) * H])
        whh_pad = whh_pad.at[:H, g * HP:g * HP + H].set(whh_t[:, g * H:(g + 1) * H])
        b_pad = b_pad.at[g * HP:g * HP + H].set(bias[g * H:(g + 1) * H])

    w_slab = jnp.zeros((W_ROWS, LANES), jnp.float32)
    w_slab = (w_slab.at[0:IP].set(wih_pad)
                     .at[IP:IP + HP].set(whh_pad)
                     .at[IP + HP].set(b_pad))

    wfc_pad = jnp.zeros((HP, LANES), jnp.float32).at[:H, :OUT_FEATURES].set(w_fc.T)
    bfc_pad = jnp.zeros((LANES,), jnp.float32).at[:OUT_FEATURES].set(b_fc)

    # Per-lane activation constants: gate blocks [i, f, g, o] of 32 lanes each.
    gate_block = jnp.arange(LANES) // HP
    is_g = (gate_block == 2)
    s_vec = jnp.where(is_g, 1.0, 0.5).astype(jnp.float32)
    a_vec = jnp.where(is_g, 1.0, 0.5).astype(jnp.float32)
    b_vec = jnp.where(is_g, 0.0, 0.5).astype(jnp.float32)

    fc_slab = jnp.zeros((FC_ROWS, LANES), jnp.float32)
    fc_slab = (fc_slab.at[0:HP].set(wfc_pad)
                      .at[HP].set(bfc_pad)
                      .at[HP + 1].set(s_vec)
                      .at[HP + 2].set(a_vec)
                      .at[HP + 3].set(b_vec))

    kernel_params = dict(w_slab=w_slab, fc_slab=fc_slab)
    return raw, kernel_params


def reference_forward(x, raw):
    """Pure-JAX replica of the PyTorch forward (for correctness check)."""
    B, T, _ = x.shape
    H = HIDDEN
    h = jnp.zeros((B, H), jnp.float32)
    c = jnp.zeros((B, H), jnp.float32)
    for t in range(T):
        g = (x[:, t, :] @ raw["w_ih"].T + raw["b_ih"]
             + h @ raw["w_hh"].T + raw["b_hh"])
        i_g = jax.nn.sigmoid(g[:, 0:H])
        f_g = jax.nn.sigmoid(g[:, H:2 * H])
        g_g = jnp.tanh(g[:, 2 * H:3 * H])
        o_g = jax.nn.sigmoid(g[:, 3 * H:4 * H])
        c = f_g * c + i_g * g_g
        h = o_g * jnp.tanh(c)
    return h @ raw["w_fc"].T + raw["b_fc"]


if __name__ == "__main__":
    key = jax.random.PRNGKey(0)
    k_x, k_p = jax.random.split(key)

    B, T = 2, 8  # small shapes consistent with LSTM(input_size=10, batch_first=True)
    x = jax.random.normal(k_x, (B, T, INPUT_SIZE), jnp.float32)

    raw_params, kernel_params = init_params(k_p)

    out = jax.block_until_ready(
        simple_rnn_forward(x, kernel_params["w_slab"], kernel_params["fc_slab"]))

    ref = reference_forward(x, raw_params)
    assert out.shape == (B, OUT_FEATURES)
    assert jnp.allclose(out, ref, atol=1e-5, rtol=1e-5), (out, ref)

    print("KERNEL_OK")
</pallas_src>

<mosaic_0001>
module attributes {stable_mosaic.version = 11 : i64} {
  func.func @_lstm_fc_kernel(%arg0: memref<64x16xf32, #tpu.memory_space<vmem>>, %arg1: memref<56x128xf32, #tpu.memory_space<vmem>>, %arg2: memref<40x128xf32, #tpu.memory_space<vmem>>, %arg3: memref<8x128xf32, #tpu.memory_space<vmem>>) attributes {dimension_semantics = [], scalar_prefetch = 0 : i64, scratch_operands = 0 : i64, tpu.core_type = #tpu.core_type<tc>} {
    %c0 = arith.constant 0 : index
    %c0_0 = arith.constant 0 : index
    %0 = vector.load %arg1[%c0, %c0_0] : memref<56x128xf32, #tpu.memory_space<vmem>>, vector<16x128xf32>
    %c16 = arith.constant 16 : index
    %c0_1 = arith.constant 0 : index
    %1 = vector.load %arg1[%c16, %c0_1] : memref<56x128xf32, #tpu.memory_space<vmem>>, vector<32x128xf32>
    %c48 = arith.constant 48 : index
    %c0_2 = arith.constant 0 : index
    %2 = vector.load %arg1[%c48, %c0_2] : memref<56x128xf32, #tpu.memory_space<vmem>>, vector<1x128xf32>
    %c0_3 = arith.constant 0 : index
    %c0_4 = arith.constant 0 : index
    %3 = vector.load %arg2[%c0_3, %c0_4] : memref<40x128xf32, #tpu.memory_space<vmem>>, vector<32x128xf32>
    %c32 = arith.constant 32 : index
    %c0_5 = arith.constant 0 : index
    %4 = vector.load %arg2[%c32, %c0_5] : memref<40x128xf32, #tpu.memory_space<vmem>>, vector<1x128xf32>
    %c33 = arith.constant 33 : index
    %c0_6 = arith.constant 0 : index
    %5 = vector.load %arg2[%c33, %c0_6] : memref<40x128xf32, #tpu.memory_space<vmem>>, vector<1x128xf32>
    %6 = vector.shape_cast %5 : vector<1x128xf32> to vector<1x128xf32>
    %7 = vector.broadcast %6 : vector<1x128xf32> to vector<8x128xf32>
    %c34 = arith.constant 34 : index
    %c0_7 = arith.constant 0 : index
    %8 = vector.load %arg2[%c34, %c0_7] : memref<40x128xf32, #tpu.memory_space<vmem>>, vector<1x128xf32>
    %9 = vector.shape_cast %8 : vector<1x128xf32> to vector<1x128xf32>
    %10 = vector.broadcast %9 : vector<1x128xf32> to vector<8x128xf32>
    %c35 = arith.constant 35 : index
    %c0_8 = arith.constant 0 : index
    %11 = vector.load %arg2[%c35, %c0_8] : memref<40x128xf32, #tpu.memory_space<vmem>>, vector<1x128xf32>
    %12 = vector.shape_cast %11 : vector<1x128xf32> to vector<1x128xf32>
    %13 = vector.broadcast %12 : vector<1x128xf32> to vector<8x128xf32>
    %c0_9 = arith.constant 0 : index
    %c0_10 = arith.constant 0 : index
    %14 = vector.load %arg0[%c0_9, %c0_10] : memref<64x16xf32, #tpu.memory_space<vmem>>, vector<64x16xf32>
    %cst = arith.constant dense<0.000000e+00> : vector<64x128xf32>
    %15 = tpu.matmul %14, %0, %cst {dimension_numbers = #tpu.dot_dimension_numbers<[1], [0], [0], [1], [0, 0, 1, 1], [], []>} : vector<64x16xf32>, vector<16x128xf32>, vector<64x128xf32> -> vector<64x128xf32>
    %16 = vector.broadcast %2 : vector<1x128xf32> to vector<64x128xf32>
    %17 = arith.addf %15, %16 : vector<64x128xf32>
    %cst_11 = arith.constant 0.000000e+00 : f32
    %18 = vector.broadcast %cst_11 : f32 to vector<8x32xf32>
    %cst_12 = arith.constant 0.000000e+00 : f32
    %19 = vector.broadcast %cst_12 : f32 to vector<8x32xf32>
    %20 = vector.extract_strided_slice %17 {offsets = [0, 0], sizes = [8, 128], strides = [1, 1]} : vector<64x128xf32> to vector<8x128xf32>
    %cst_13 = arith.constant dense<0.000000e+00> : vector<8x128xf32>
    %21 = tpu.matmul %18, %1, %cst_13 {dimension_numbers = #tpu.dot_dimension_numbers<[1], [0], [0], [1], [0, 0, 1, 1], [], []>} : vector<8x32xf32>, vector<32x128xf32>, vector<8x128xf32> -> vector<8x128xf32>
    %22 = arith.addf %20, %21 : vector<8x128xf32>
    %23 = arith.mulf %22, %7 : vector<8x128xf32>
    %24 = math.tanh %23 : vector<8x128xf32>
    %25 = arith.mulf %24, %10 : vector<8x128xf32>
    %26 = arith.addf %25, %13 : vector<8x128xf32>
    %27 = vector.extract_strided_slice %26 {offsets = [0, 0], sizes = [8, 32], strides = [1, 1]} : vector<8x128xf32> to vector<8x32xf32>
    %28 = vector.extract_strided_slice %26 {offsets = [0, 32], sizes = [8, 32], strides = [1, 1]} : vector<8x128xf32> to vector<8x32xf32>
    %29 = vector.extract_strided_slice %26 {offsets = [0, 64], sizes = [8, 32], strides = [1, 1]} : vector<8x128xf32> to vector<8x32xf32>
    %30 = vector.extract_strided_slice %26 {offsets = [0, 96], sizes = [8, 32], strides = [1, 1]} : vector<8x128xf32> to vector<8x32xf32>
    %31 = arith.mulf %28, %19 : vector<8x32xf32>
    %32 = arith.mulf %27, %29 : vector<8x32xf32>
    %33 = arith.addf %31, %32 : vector<8x32xf32>
    %34 = math.tanh %33 : vector<8x32xf32>
    %35 = arith.mulf %30, %34 : vector<8x32xf32>
    %36 = vector.extract_strided_slice %17 {offsets = [8, 0], sizes = [8, 128], strides = [1, 1]} : vector<64x128xf32> to vector<8x128xf32>
    %cst_14 = arith.constant dense<0.000000e+00> : vector<8x128xf32>
    %37 = tpu.matmul %35, %1, %cst_14 {dimension_numbers = #tpu.dot_dimension_numbers<[1], [0], [0], [1], [0, 0, 1, 1], [], []>} : vector<8x32xf32>, vector<32x128xf32>, vector<8x128xf32> -> vector<8x128xf32>
    %38 = arith.addf %36, %37 : vector<8x128xf32>
    %39 = arith.mulf %38, %7 : vector<8x128xf32>
    %40 = math.tanh %39 : vector<8x128xf32>
    %41 = arith.mulf %40, %10 : vector<8x128xf32>
    %42 = arith.addf %41, %13 : vector<8x128xf32>
    %43 = vector.extract_strided_slice %42 {offsets = [0, 0], sizes = [8, 32], strides = [1, 1]} : vector<8x128xf32> to vector<8x32xf32>
    %44 = vector.extract_strided_slice %42 {offsets = [0, 32], sizes = [8, 32], strides = [1, 1]} : vector<8x128xf32> to vector<8x32xf32>
    %45 = vector.extract_strided_slice %42 {offsets = [0, 64], sizes = [8, 32], strides = [1, 1]} : vector<8x128xf32> to vector<8x32xf32>
    %46 = vector.extract_strided_slice %42 {offsets = [0, 96], sizes = [8, 32], strides = [1, 1]} : vector<8x128xf32> to vector<8x32xf32>
    %47 = arith.mulf %44, %33 : vector<8x32xf32>
    %48 = arith.mulf %43, %45 : vector<8x32xf32>
    %49 = arith.addf %47, %48 : vector<8x32xf32>
    %50 = math.tanh %49 : vector<8x32xf32>
    %51 = arith.mulf %46, %50 : vector<8x32xf32>
    %52 = vector.extract_strided_slice %17 {offsets = [16, 0], sizes = [8, 128], strides = [1, 1]} : vector<64x128xf32> to vector<8x128xf32>
    %cst_15 = arith.constant dense<0.000000e+00> : vector<8x128xf32>
    %53 = tpu.matmul %51, %1, %cst_15 {dimension_numbers = #tpu.dot_dimension_numbers<[1], [0], [0], [1], [0, 0, 1, 1], [], []>} : vector<8x32xf32>, vector<32x128xf32>, vector<8x128xf32> -> vector<8x128xf32>
    %54 = arith.addf %52, %53 : vector<8x128xf32>
    %55 = arith.mulf %54, %7 : vector<8x128xf32>
    %56 = math.tanh %55 : vector<8x128xf32>
    %57 = arith.mulf %56, %10 : vector<8x128xf32>
    %58 = arith.addf %57, %13 : vector<8x128xf32>
    %59 = vector.extract_strided_slice %58 {offsets = [0, 0], sizes = [8, 32], strides = [1, 1]} : vector<8x128xf32> to vector<8x32xf32>
    %60 = vector.extract_strided_slice %58 {offsets = [0, 32], sizes = [8, 32], strides = [1, 1]} : vector<8x128xf32> to vector<8x32xf32>
    %61 = vector.extract_strided_slice %58 {offsets = [0, 64], sizes = [8, 32], strides = [1, 1]} : vector<8x128xf32> to vector<8x32xf32>
    %62 = vector.extract_strided_slice %58 {offsets = [0, 96], sizes = [8, 32], strides = [1, 1]} : vector<8x128xf32> to vector<8x32xf32>
    %63 = arith.mulf %60, %49 : vector<8x32xf32>
    %64 = arith.mulf %59, %61 : vector<8x32xf32>
    %65 = arith.addf %63, %64 : vector<8x32xf32>
    %66 = math.tanh %65 : vector<8x32xf32>
    %67 = arith.mulf %62, %66 : vector<8x32xf32>
    %68 = vector.extract_strided_slice %17 {offsets = [24, 0], sizes = [8, 128], strides = [1, 1]} : vector<64x128xf32> to vector<8x128xf32>
    %cst_16 = arith.constant dense<0.000000e+00> : vector<8x128xf32>
    %69 = tpu.matmul %67, %1, %cst_16 {dimension_numbers = #tpu.dot_dimension_numbers<[1], [0], [0], [1], [0, 0, 1, 1], [], []>} : vector<8x32xf32>, vector<32x128xf32>, vector<8x128xf32> -> vector<8x128xf32>
    %70 = arith.addf %68, %69 : vector<8x128xf32>
    %71 = arith.mulf %70, %7 : vector<8x128xf32>
    %72 = math.tanh %71 : vector<8x128xf32>
    %73 = arith.mulf %72, %10 : vector<8x128xf32>
    %74 = arith.addf %73, %13 : vector<8x128xf32>
    %75 = vector.extract_strided_slice %74 {offsets = [0, 0], sizes = [8, 32], strides = [1, 1]} : vector<8x128xf32> to vector<8x32xf32>
    %76 = vector.extract_strided_slice %74 {offsets = [0, 32], sizes = [8, 32], strides = [1, 1]} : vector<8x128xf32> to vector<8x32xf32>
    %77 = vector.extract_strided_slice %74 {offsets = [0, 64], sizes = [8, 32], strides = [1, 1]} : vector<8x128xf32> to vector<8x32xf32>
    %78 = vector.extract_strided_slice %74 {offsets = [0, 96], sizes = [8, 32], strides = [1, 1]} : vector<8x128xf32> to vector<8x32xf32>
    %79 = arith.mulf %76, %65 : vector<8x32xf32>
    %80 = arith.mulf %75, %77 : vector<8x32xf32>
    %81 = arith.addf %79, %80 : vector<8x32xf32>
    %82 = math.tanh %81 : vector<8x32xf32>
    %83 = arith.mulf %78, %82 : vector<8x32xf32>
    %84 = vector.extract_strided_slice %17 {offsets = [32, 0], sizes = [8, 128], strides = [1, 1]} : vector<64x128xf32> to vector<8x128xf32>
    %cst_17 = arith.constant dense<0.000000e+00> : vector<8x128xf32>
    %85 = tpu.matmul %83, %1, %cst_17 {dimension_numbers = #tpu.dot_dimension_numbers<[1], [0], [0], [1], [0, 0, 1, 1], [], []>} : vector<8x32xf32>, vector<32x128xf32>, vector<8x128xf32> -> vector<8x128xf32>
    %86 = arith.addf %84, %85 : vector<8x128xf32>
    %87 = arith.mulf %86, %7 : vector<8x128xf32>
    %88 = math.tanh %87 : vector<8x128xf32>
    %89 = arith.mulf %88, %10 : vector<8x128xf32>
    %90 = arith.addf %89, %13 : vector<8x128xf32>
    %91 = vector.extract_strided_slice %90 {offsets = [0, 0], sizes = [8, 32], strides = [1, 1]} : vector<8x128xf32> to vector<8x32xf32>
    %92 = vector.extract_strided_slice %90 {offsets = [0, 32], sizes = [8, 32], strides = [1, 1]} : vector<8x128xf32> to vector<8x32xf32>
    %93 = vector.extract_strided_slice %90 {offsets = [0, 64], sizes = [8, 32], strides = [1, 1]} : vector<8x128xf32> to vector<8x32xf32>
    %94 = vector.extract_strided_slice %90 {offsets = [0, 96], sizes = [8, 32], strides = [1, 1]} : vector<8x128xf32> to vector<8x32xf32>
    %95 = arith.mulf %92, %81 : vector<8x32xf32>
    %96 = arith.mulf %91, %93 : vector<8x32xf32>
    %97 = arith.addf %95, %96 : vector<8x32xf32>
    %98 = math.tanh %97 : vector<8x32xf32>
    %99 = arith.mulf %94, %98 : vector<8x32xf32>
    %100 = vector.extract_strided_slice %17 {offsets = [40, 0], sizes = [8, 128], strides = [1, 1]} : vector<64x128xf32> to vector<8x128xf32>
    %cst_18 = arith.constant dense<0.000000e+00> : vector<8x128xf32>
    %101 = tpu.matmul %99, %1, %cst_18 {dimension_numbers = #tpu.dot_dimension_numbers<[1], [0], [0], [1], [0, 0, 1, 1], [], []>} : vector<8x32xf32>, vector<32x128xf32>, vector<8x128xf32> -> vector<8x128xf32>
    %102 = arith.addf %100, %101 : vector<8x128xf32>
    %103 = arith.mulf %102, %7 : vector<8x128xf32>
    %104 = math.tanh %103 : vector<8x128xf32>
    %105 = arith.mulf %104, %10 : vector<8x128xf32>
    %106 = arith.addf %105, %13 : vector<8x128xf32>
    %107 = vector.extract_strided_slice %106 {offsets = [0, 0], sizes = [8, 32], strides = [1, 1]} : vector<8x128xf32> to vector<8x32xf32>
    %108 = vector.extract_strided_slice %106 {offsets = [0, 32], sizes = [8, 32], strides = [1, 1]} : vector<8x128xf32> to vector<8x32xf32>
    %109 = vector.extract_strided_slice %106 {offsets = [0, 64], sizes = [8, 32], strides = [1, 1]} : vector<8x128xf32> to vector<8x32xf32>
    %110 = vector.extract_strided_slice %106 {offsets = [0, 96], sizes = [8, 32], strides = [1, 1]} : vector<8x128xf32> to vector<8x32xf32>
    %111 = arith.mulf %108, %97 : vector<8x32xf32>
    %112 = arith.mulf %107, %109 : vector<8x32xf32>
    %113 = arith.addf %111, %112 : vector<8x32xf32>
    %114 = math.tanh %113 : vector<8x32xf32>
    %115 = arith.mulf %110, %114 : vector<8x32xf32>
    %116 = vector.extract_strided_slice %17 {offsets = [48, 0], sizes = [8, 128], strides = [1, 1]} : vector<64x128xf32> to vector<8x128xf32>
    %cst_19 = arith.constant dense<0.000000e+00> : vector<8x128xf32>
    %117 = tpu.matmul %115, %1, %cst_19 {dimension_numbers = #tpu.dot_dimension_numbers<[1], [0], [0], [1], [0, 0, 1, 1], [], []>} : vector<8x32xf32>, vector<32x128xf32>, vector<8x128xf32> -> vector<8x128xf32>
    %118 = arith.addf %116, %117 : vector<8x128xf32>
    %119 = arith.mulf %118, %7 : vector<8x128xf32>
    %120 = math.tanh %119 : vector<8x128xf32>
    %121 = arith.mulf %120, %10 : vector<8x128xf32>
    %122 = arith.addf %121, %13 : vector<8x128xf32>
    %123 = vector.extract_strided_slice %122 {offsets = [0, 0], sizes = [8, 32], strides = [1, 1]} : vector<8x128xf32> to vector<8x32xf32>
    %124 = vector.extract_strided_slice %122 {offsets = [0, 32], sizes = [8, 32], strides = [1, 1]} : vector<8x128xf32> to vector<8x32xf32>
    %125 = vector.extract_strided_slice %122 {offsets = [0, 64], sizes = [8, 32], strides = [1, 1]} : vector<8x128xf32> to vector<8x32xf32>
    %126 = vector.extract_strided_slice %122 {offsets = [0, 96], sizes = [8, 32], strides = [1, 1]} : vector<8x128xf32> to vector<8x32xf32>
    %127 = arith.mulf %124, %113 : vector<8x32xf32>
    %128 = arith.mulf %123, %125 : vector<8x32xf32>
    %129 = arith.addf %127, %128 : vector<8x32xf32>
    %130 = math.tanh %129 : vector<8x32xf32>
    %131 = arith.mulf %126, %130 : vector<8x32xf32>
    %132 = vector.extract_strided_slice %17 {offsets = [56, 0], sizes = [8, 128], strides = [1, 1]} : vector<64x128xf32> to vector<8x128xf32>
    %cst_20 = arith.constant dense<0.000000e+00> : vector<8x128xf32>
    %133 = tpu.matmul %131, %1, %cst_20 {dimension_numbers = #tpu.dot_dimension_numbers<[1], [0], [0], [1], [0, 0, 1, 1], [], []>} : vector<8x32xf32>, vector<32x128xf32>, vector<8x128xf32> -> vector<8x128xf32>
    %134 = arith.addf %132, %133 : vector<8x128xf32>
    %135 = arith.mulf %134, %7 : vector<8x128xf32>
    %136 = math.tanh %135 : vector<8x128xf32>
    %137 = arith.mulf %136, %10 : vector<8x128xf32>
    %138 = arith.addf %137, %13 : vector<8x128xf32>
    %139 = vector.extract_strided_slice %138 {offsets = [0, 0], sizes = [8, 32], strides = [1, 1]} : vector<8x128xf32> to vector<8x32xf32>
    %140 = vector.extract_strided_slice %138 {offsets = [0, 32], sizes = [8, 32], strides = [1, 1]} : vector<8x128xf32> to vector<8x32xf32>
    %141 = vector.extract_strided_slice %138 {offsets = [0, 64], sizes = [8, 32], strides = [1, 1]} : vector<8x128xf32> to vector<8x32xf32>
    %142 = vector.extract_strided_slice %138 {offsets = [0, 96], sizes = [8, 32], strides = [1, 1]} : vector<8x128xf32> to vector<8x32xf32>
    %143 = arith.mulf %140, %129 : vector<8x32xf32>
    %144 = arith.mulf %139, %141 : vector<8x32xf32>
    %145 = arith.addf %143, %144 : vector<8x32xf32>
    %146 = math.tanh %145 : vector<8x32xf32>
    %147 = arith.mulf %142, %146 : vector<8x32xf32>
    %cst_21 = arith.constant dense<0.000000e+00> : vector<8x128xf32>
    %148 = tpu.matmul %147, %3, %cst_21 {dimension_numbers = #tpu.dot_dimension_numbers<[1], [0], [0], [1], [0, 0, 1, 1], [], []>} : vector<8x32xf32>, vector<32x128xf32>, vector<8x128xf32> -> vector<8x128xf32>
    %149 = vector.broadcast %4 : vector<1x128xf32> to vector<8x128xf32>
    %150 = arith.addf %148, %149 : vector<8x128xf32>
    %c0_22 = arith.constant 0 : index
    %c0_23 = arith.constant 0 : index
    %151 = vector.load %arg3[%c0_22, %c0_23] : memref<8x128xf32, #tpu.memory_space<vmem>>, vector<8x128xf32>
    tpu.vector_store %arg3[%c0_22, %c0_23], %150 {strides = array<i32>} : memref<8x128xf32, #tpu.memory_space<vmem>>, vector<8x128xf32>,
    return
  }
}

</mosaic_0001>

<bundles_post_ra>
// kernel: simple_rnn_forward.1
= control target key start
LH: loop header
LB: loop body
LE: loop exit
PB: predicated region body
PF: predicated region fallthrough
CT: control target
= control target key end

     0   :  { %v1328_v0 = vmov 0.0|0.0   ;;  %vm53_vm0 = vcmask 130048   ;;  %vm1329_vm1 = vmmov 0   ;;  %v1330_v4 = vmov 0.0   ;;  %s1331_s8 = smov 64   ;;  %s1332_s9 = smov 32   ;;  %s1582_s1 = inlined_call_operand.vmem [shape: f32[56,128], index: 1, kind: input, shape index: {}]   ;;  %s1583_s0 = inlined_call_operand.vmem [shape: f32[64,16], index: 0, kind: input, shape index: {}]   ;;  %s1584_s2 = inlined_call_operand.vmem [shape: f32[40,128], index: 2, kind: input, shape index: {}]   ;;  %s1585_s3 = inlined_call_operand.vmem [shape: f32[8,128], index: 3, kind: output, shape index: {}]  }
   0x1   :  { %1237 = vmatprep.subr.bf16.mxu1 %v1328_v0  ;;  %v14_v1 = vld [vmem:[%s1582_s1] sm:$0xff]  ;;  %v15_v2 = vld [vmem:[%s1582_s1 + $0x8] sm:$0xff]  ;;  %v16_v3 = vld [vmem:[%s1582_s1 + $0x10] sm:$0xff]  ;;  %1142 = vmatprep.mubr.msk.f32.mxu1 %vm1329_vm1, %v1330_v4  ;;  %vm183_vm2 = vcmask 261120  }
   0x2   :  { %v17_v5 = vld [vmem:[%s1582_s1 + $0x18] sm:$0xff]  ;;  %v18_v6 = vld [vmem:[%s1582_s1 + $0x20] sm:$0xff]  ;;  %v19_v7 = vld [vmem:[%s1582_s1 + $0x28] sm:$0xff]  ;;  %v1233_v8 = vpack.c.bf16 %v15_v2, %v14_v1 }
   0x3   :  { %v1374_v9 = vpack.c.bf16 %v17_v5, %v16_v3  ;;  %v41_v10 = vld [vmem:[%s1583_s0] sm:$0xff]  ;;  %v1380_v11 = vpack.c.bf16 %v19_v7, %v18_v6  ;;  %v42_v12 = vld [vmem:[%s1583_s0 + $0x8] sm:$0xff]  ;;  %v1405_v13 = vld [vmem:[%s1582_s1 + $0x30] ss:$0 sm:$0xff] }
   0x4   :  { %1234 = vmatprep.subr.bf16.mxu0 %v1233_v8  ;;  %1122 = vmatprep.mubr.msk.f32.mxu0 %vm53_vm0, %v41_v10  ;;  %v1411_v17 = vld [vmem:[%s1584_s2 + $0x21] ss:$0 sm:$0xff]  ;;  %v1417_v22 = vld [vmem:[%s1584_s2 + $0x22] ss:$0 sm:$0xff]  ;;  %v1422_v24 = vld [vmem:[%s1584_s2 + $0x23] ss:$0 sm:$0xff] }
   0x5   :  { %1239 = vmatpush3.bf16.msra.mxu1 %v1374_v9  ;;  %1236 = vmatpush3.bf16.msra.mxu0 %v1233_v8  ;;  %v43_v49 = vld [vmem:[%s1583_s0 + $0x10] sm:$0xff]  ;;  %v44_v50 = vld [vmem:[%s1583_s0 + $0x18] sm:$0xff]  ;;  %v45_v51 = vld [vmem:[%s1583_s0 + $0x20] sm:$0xff] }
   0x6   :  { %1240 = vmatprep.subr.bf16.mxu1 %v1328_v0  ;;  %1249 = vmatprep.subr.bf16.mxu0 %v1328_v0  ;;  %v46_v52 = vld [vmem:[%s1583_s0 + $0x28] sm:$0xff]  ;;  %v47_v53 = vld [vmem:[%s1583_s0 + $0x30] sm:$0xff]  ;;  %v48_v54 = vld [vmem:[%s1583_s0 + $0x38] sm:$0xff] }
   0x8   :  { %1123 = vmatmul.mubr.msk.f32.vlgmr.msra.gmra.mrb[0].mxu0 %vm53_vm0, %v42_v12 }
   0x9   :  { %1242 = vmatpush3.bf16.msra.mxu1 %v1380_v11  ;;  %1251 = vmatpush3.bf16.msra.mxu0 %v1374_v9 }
   0xa   :  { %1243 = vmatprep.subr.bf16.mxu1 %v1328_v0  ;;  %1252 = vmatprep.subr.bf16.mxu0 %v1328_v0 }
   0xb   :  { %1125 = vmatprep.mubr.msk.f32.mxu0 %vm53_vm0, %v43_v49 }
   0xc   :  { %1143 = vmatmul.mubr.f32.vlgmr.msra.gmra.mrb[0].mxu1 %v1330_v4  ;;  %1126 = vmatmul.mubr.msk.f32.gmra.mrb[2].mxu0 %vm53_vm0, %v44_v50 }
   0xd   :  { %1245 = vmatpush3.bf16.msra.mxu1 %v1374_v9  ;;  %1153 = vmatprep.mubr.msk.f32.mxu1 %vm1329_vm1, %v1330_v4 }
   0xe   :  { %1246 = vmatprep.subr.bf16.mxu1 %v1328_v0  ;;  %1254 = vmatpush3.bf16.msra.mxu0 %v1380_v11 }
   0xf   :  { %1261 = vmatprep.subr.bf16.mxu0 %v1328_v0  ;;  %1128 = vmatprep.mubr.msk.f32.mxu0 %vm53_vm0, %v45_v51 }
  0x10   :  { %1129 = vmatmul.mubr.msk.f32.gmra.mrb[4].mxu0 %vm53_vm0, %v46_v52 }
  0x11   :  { %1248 = vmatpush3.bf16.msra.mxu1 %v1380_v11  ;;  %1131 = vmatprep.mubr.msk.f32.mxu0 %vm53_vm0, %v47_v53 }
  0x12   :  { %1255 = vmatprep.subr.bf16.mxu1 %v1328_v0 }
  0x14   :  { %1132 = vmatmul.mubr.msk.f32.gmra.mrb[6].mxu0 %vm53_vm0, %v48_v54 }
  0x15   :  { %1164 = vmatprep.mubr.msk.f32.mxu0 %vm1329_vm1, %v1330_v4 }
  0xdb   :  { %v1124_v14 = vpop.f32.mrb[0].mxu0 }
  0xdc   :  { %v144_v15 = vpop.f32.mrb[1].mxu0  ;;  %v150_v36 = vadd.f32 %v1124_v14, %v1405_v13 }
  0xdd   :  { %v145_v16 = vadd.f32 %v1405_v13, %v144_v15 }
  0xdf   :  { %v253_v18 = vpop.f32.mrb[0].mxu1  ;;  %v1127_v58 = vpop.f32.mrb[2].mxu0 }
  0xe0   :  { %v257_v19 = vadd.f32 %v253_v18, %v145_v16  ;;  %v1144_v20 = vpop.f32.mrb[1].mxu1  ;;  %v154_v59 = vpop.f32.mrb[3].mxu0 }
  0xe1   :  { %v155_v2 = vadd.f32 %v1405_v13, %v154_v59 }
  0xe2   :  { %v258_v21 = vmul.f32 %v1411_v17, %v257_v19 }
  0xe3   :  { %v1471_v60 = vpop.f32.mrb[4].mxu0 }
  0xe4   :  { %1296 = vtanh.f32 %v258_v21  ;;  %v1473_v61 = vpop.f32.mrb[5].mxu0 }
  0xe7   :  { %v1475_v62 = vpop.f32.mrb[6].mxu0 }
  0xe8   :  { %v1477_v63 = vpop.f32.mrb[7].mxu0 }
  0xee   :  { %v1297_v23 = vpop.eup %1296 }
  0xef   :  { %v260_v25 = vmul.f32 %v1297_v23, %v1417_v22 }
  0xf1   :  { %v261_v26 = vadd.f32 %v1422_v24, %v260_v25 }
  0xf3   :  { %264 = vrot.lane.b32.xlu0 %v261_v26, %s1331_s8  ;;  %v262_v29 = vmul.f32 0.0, %v261_v26 }
 0x165   :  { %v265_v27 = vpop.permute.xlu0 %264 }
 0x166   :  { %v267_v28 = vmul.f32 %v265_v27, %v261_v26 }
 0x168   :  { %269 = vrot.lane.b32.xlu0 %v267_v28, %s1332_s9 }
 0x1da   :  { %v270_v30 = vpop.permute.xlu0 %269 }
 0x1db   :  { %v272_v31 = vadd.f32 %v270_v30, %v262_v29 }
 0x1dd   :  { %1298 = vtanh.f32 %v272_v31 }
 0x1e7   :  { %v1299_v32 = vpop.eup %1298 }
 0x1e8   :  { %275 = vrot.lane.b32.xlu1 %v1299_v32, %s1331_s8 }
 0x25a   :  { %v276_v33 = vpop.permute.xlu1 %275 }
 0x25b   :  { %v278_v34 = vmul.f32 %v276_v33, %v261_v26  ;;  %v160_v26 = vadd.f32 %v1127_v58, %v1405_v13 }
 0x25d   :  { %280 = vrot.lane.b32.xlu1 %v278_v34, %s1332_s9 }
 0x2cf   :  { %v281_v35 = vpop.permute.xlu1 %280 }
 0x2d0   :  { %1154 = vmatmul.mubr.msk.f32.vlgmr.msra.gmra.mrb[2].mxu1 %vm183_vm2, %v281_v35 }
 0x2d1   :  { %1257 = vmatpush3.bf16.msra.mxu1 %v1374_v9  ;;  %1175 = vmatprep.mubr.msk.f32.mxu1 %vm1329_vm1, %v1330_v4 }
 0x2d2   :  { %1258 = vmatprep.subr.bf16.mxu1 %v1328_v0 }
 0x2d5   :  { %1260 = vmatpush3.bf16.msra.mxu1 %v1380_v11 }
 0x2d6   :  { %1267 = vmatprep.subr.bf16.mxu1 %v1328_v0 }
 0x3a3   :  { %v350_v37 = vpop.f32.mrb[2].mxu1 }
 0x3a4   :  { %v354_v38 = vadd.f32 %v350_v37, %v150_v36  ;;  %v1155_v39 = vpop.f32.mrb[3].mxu1 }
 0x3a6   :  { %v355_v40 = vmul.f32 %v1411_v17, %v354_v38 }
 0x3a8   :  { %1300 = vtanh.f32 %v355_v40 }
 0x3b2   :  { %v1301_v41 = vpop.eup %1300 }
 0x3b3   :  { %v357_v42 = vmul.f32 %v1301_v41, %v1417_v22 }
 0x3b5   :  { %v358_v43 = vadd.f32 %v1422_v24, %v357_v42 }
 0x3b7   :  { %361 = vrot.lane.b32.xlu0 %v358_v43, %s1331_s8  ;;  %v359_v46 = vmul.f32 %v358_v43, %v272_v31 }
 0x429   :  { %v362_v44 = vpop.permute.xlu0 %361 }
 0x42a   :  { %v364_v45 = vmul.f32 %v362_v44, %v358_v43 }
 0x42c   :  { %366 = vrot.lane.b32.xlu1 %v364_v45, %s1332_s9 }
 0x49e   :  { %v367_v47 = vpop.permute.xlu1 %366 }
 0x49f   :  { %v369_v48 = vadd.f32 %v367_v47, %v359_v46 }
 0x4a1   :  { %1302 = vtanh.f32 %v369_v48 }
 0x4ab   :  { %v1303_v55 = vpop.eup %1302 }
 0x4ac   :  { %372 = vrot.lane.b32.xlu0 %v1303_v55, %s1331_s8 }
 0x51e   :  { %v373_v56 = vpop.permute.xlu0 %372 }
 0x51f   :  { %v375_v57 = vmul.f32 %v373_v56, %v358_v43  ;;  %v165_v43 = vadd.f32 %v1405_v13, %v1473_v61  ;;  %v170_v61 = vadd.f32 %v1471_v60, %v1405_v13 }
 0x521   :  { %377 = vrot.lane.b32.xlu1 %v375_v57, %s1332_s9 }
 0x593   :  { %v378_v1 = vpop.permute.xlu1 %377 }
 0x594   :  { %1165 = vmatmul.mubr.msk.f32.vlgmr.msra.gmra.mrb[8].mxu0 %vm183_vm2, %v378_v1 }
 0x595   :  { %1263 = vmatpush3.bf16.msra.mxu0 %v1374_v9  ;;  %1186 = vmatprep.mubr.msk.f32.mxu0 %vm1329_vm1, %v1330_v4 }
 0x596   :  { %1264 = vmatprep.subr.bf16.mxu0 %v1328_v0 }
 0x599   :  { %1266 = vmatpush3.bf16.msra.mxu0 %v1380_v11 }
 0x59a   :  { %1273 = vmatprep.subr.bf16.mxu0 %v1328_v0 }
 0x667   :  { %v447_v3 = vpop.f32.mrb[8].mxu0 }
 0x668   :  { %v451_v5 = vadd.f32 %v447_v3, %v155_v2  ;;  %v1166_v6 = vpop.f32.mrb[9].mxu0 }
 0x66a   :  { %v452_v7 = vmul.f32 %v1411_v17, %v451_v5 }
 0x66c   :  { %1304 = vtanh.f32 %v452_v7 }
 0x676   :  { %v1305_v8 = vpop.eup %1304 }
 0x677   :  { %v454_v10 = vmul.f32 %v1305_v8, %v1417_v22 }
 0x679   :  { %v455_v12 = vadd.f32 %v1422_v24, %v454_v10 }
 0x67b   :  { %458 = vrot.lane.b32.xlu0 %v455_v12, %s1331_s8  ;;  %v456_v16 = vmul.f32 %v455_v12, %v369_v48 }
 0x6ed   :  { %v459_v14 = vpop.permute.xlu0 %458 }
 0x6ee   :  { %v461_v15 = vmul.f32 %v459_v14, %v455_v12 }
 0x6f0   :  { %463 = vrot.lane.b32.xlu1 %v461_v15, %s1332_s9 }
 0x762   :  { %v464_v18 = vpop.permute.xlu1 %463 }
 0x763   :  { %v466_v19 = vadd.f32 %v464_v18, %v456_v16 }
 0x765   :  { %1306 = vtanh.f32 %v466_v19 }
 0x76f   :  { %v1307_v20 = vpop.eup %1306 }
 0x770   :  { %469 = vrot.lane.b32.xlu0 %v1307_v20, %s1331_s8 }
 0x7e2   :  { %v470_v21 = vpop.permute.xlu0 %469 }
 0x7e3   :  { %v472_v23 = vmul.f32 %v470_v21, %v455_v12 }
 0x7e5   :  { %474 = vrot.lane.b32.xlu1 %v472_v23, %s1332_s9 }
 0x857   :  { %v475_v25 = vpop.permute.xlu1 %474 }
 0x858   :  { %1176 = vmatmul.mubr.msk.f32.vlgmr.msra.gmra.mrb[4].mxu1 %vm183_vm2, %v475_v25 }
 0x859   :  { %1269 = vmatpush3.bf16.msra.mxu1 %v1374_v9  ;;  %1197 = vmatprep.mubr.msk.f32.mxu1 %vm1329_vm1, %v1330_v4 }
 0x85a   :  { %1270 = vmatprep.subr.bf16.mxu1 %v1328_v0 }
 0x85d   :  { %1272 = vmatpush3.bf16.msra.mxu1 %v1380_v11 }
 0x85e   :  { %1279 = vmatprep.subr.bf16.mxu1 %v1328_v0 }
 0x92b   :  { %v544_v27 = vpop.f32.mrb[4].mxu1 }
 0x92c   :  { %v548_v28 = vadd.f32 %v544_v27, %v160_v26  ;;  %v1177_v29 = vpop.f32.mrb[5].mxu1 }
 0x92e   :  { %v549_v30 = vmul.f32 %v1411_v17, %v548_v28 }
 0x930   :  { %1308 = vtanh.f32 %v549_v30 }
 0x93a   :  { %v1309_v31 = vpop.eup %1308 }
 0x93b   :  { %v551_v32 = vmul.f32 %v1309_v31, %v1417_v22 }
 0x93d   :  { %v552_v33 = vadd.f32 %v1422_v24, %v551_v32 }
 0x93f   :  { %555 = vrot.lane.b32.xlu0 %v552_v33, %s1331_s8  ;;  %v553_v36 = vmul.f32 %v552_v33, %v466_v19  ;;  %v175_v19 = vadd.f32 %v1405_v13, %v1477_v63 }
 0x9b1   :  { %v556_v34 = vpop.permute.xlu0 %555 }
 0x9b2   :  { %v558_v35 = vmul.f32 %v556_v34, %v552_v33 }
 0x9b4   :  { %560 = vrot.lane.b32.xlu1 %v558_v35, %s1332_s9 }
 0xa26   :  { %v561_v37 = vpop.permute.xlu1 %560 }
 0xa27   :  { %v563_v38 = vadd.f32 %v561_v37, %v553_v36  ;;  %v180_v36 = vadd.f32 %v1475_v62, %v1405_v13 }
 0xa29   :  { %1310 = vtanh.f32 %v563_v38 }
 0xa33   :  { %v1311_v39 = vpop.eup %1310 }
 0xa34   :  { %566 = vrot.lane.b32.xlu0 %v1311_v39, %s1331_s8 }
 0xaa6   :  { %v567_v40 = vpop.permute.xlu0 %566 }
 0xaa7   :  { %v569_v41 = vmul.f32 %v567_v40, %v552_v33 }
 0xaa9   :  { %571 = vrot.lane.b32.xlu1 %v569_v41, %s1332_s9 }
 0xb1b   :  { %v572_v42 = vpop.permute.xlu1 %571 }
 0xb1c   :  { %1187 = vmatmul.mubr.msk.f32.vlgmr.msra.gmra.mrb[10].mxu0 %vm183_vm2, %v572_v42 }
 0xb1d   :  { %1275 = vmatpush3.bf16.msra.mxu0 %v1374_v9  ;;  %1208 = vmatprep.mubr.msk.f32.mxu0 %vm1329_vm1, %v1330_v4 }
 0xb1e   :  { %1276 = vmatprep.subr.bf16.mxu0 %v1328_v0 }
 0xb21   :  { %1278 = vmatpush3.bf16.msra.mxu0 %v1380_v11 }
 0xb22   :  { %1285 = vmatprep.subr.bf16.mxu0 %v1328_v0 }
 0xbef   :  { %v641_v44 = vpop.f32.mrb[10].mxu0 }
 0xbf0   :  { %v645_v45 = vadd.f32 %v641_v44, %v165_v43  ;;  %v1188_v46 = vpop.f32.mrb[11].mxu0 }
 0xbf2   :  { %v646_v47 = vmul.f32 %v1411_v17, %v645_v45 }
 0xbf4   :  { %1312 = vtanh.f32 %v646_v47 }
 0xbfe   :  { %v1313_v48 = vpop.eup %1312 }
 0xbff   :  { %v648_v49 = vmul.f32 %v1313_v48, %v1417_v22  ;;  %v24_v48 = vld [vmem:[%s1584_s2 + $0x18] sm:$0xff] }
 0xc01   :  { %v649_v50 = vadd.f32 %v1422_v24, %v648_v49 }
 0xc03   :  { %652 = vrot.lane.b32.xlu0 %v649_v50, %s1331_s8  ;;  %v650_v53 = vmul.f32 %v649_v50, %v563_v38 }
 0xc75   :  { %v653_v51 = vpop.permute.xlu0 %652 }
 0xc76   :  { %v655_v52 = vmul.f32 %v653_v51, %v649_v50 }
 0xc78   :  { %657 = vrot.lane.b32.xlu1 %v655_v52, %s1332_s9 }
 0xcea   :  { %v658_v54 = vpop.permute.xlu1 %657 }
 0xceb   :  { %v660_v55 = vadd.f32 %v658_v54, %v650_v53  ;;  %v1061_v54 = vld [vmem:[%s1584_s2 + $0x20] ss:$0 sm:$0xff] }
 0xced   :  { %1314 = vtanh.f32 %v660_v55 }
 0xcf7   :  { %v1315_v56 = vpop.eup %1314 }
 0xcf8   :  { %663 = vrot.lane.b32.xlu0 %v1315_v56, %s1331_s8 }
 0xd6a   :  { %v664_v57 = vpop.permute.xlu0 %663 }
 0xd6b   :  { %v666_v58 = vmul.f32 %v664_v57, %v649_v50 }
 0xd6d   :  { %668 = vrot.lane.b32.xlu1 %v666_v58, %s1332_s9 }
 0xddf   :  { %v669_v59 = vpop.permute.xlu1 %668 }
 0xde0   :  { %1198 = vmatmul.mubr.msk.f32.vlgmr.msra.gmra.mrb[6].mxu1 %vm183_vm2, %v669_v59 }
 0xde1   :  { %1281 = vmatpush3.bf16.msra.mxu1 %v1374_v9  ;;  %1219 = vmatprep.mubr.msk.f32.mxu1 %vm1329_vm1, %v1330_v4 }
 0xde2   :  { %1282 = vmatprep.subr.bf16.mxu1 %v1328_v0 }
 0xde5   :  { %1284 = vmatpush3.bf16.msra.mxu1 %v1380_v11 }
 0xeb3   :  { %v738_v1 = vpop.f32.mrb[6].mxu1 }
 0xeb4   :  { %v742_v2 = vadd.f32 %v738_v1, %v170_v61  ;;  %v1199_v3 = vpop.f32.mrb[7].mxu1 }
 0xeb6   :  { %v743_v5 = vmul.f32 %v1411_v17, %v742_v2 }
 0xeb8   :  { %1316 = vtanh.f32 %v743_v5 }
 0xec2   :  { %v1317_v6 = vpop.eup %1316 }
 0xec3   :  { %v745_v7 = vmul.f32 %v1317_v6, %v1417_v22 }
 0xec5   :  { %v746_v9 = vadd.f32 %v1422_v24, %v745_v7 }
 0xec7   :  { %749 = vrot.lane.b32.xlu0 %v746_v9, %s1331_s8  ;;  %v747_v11 = vmul.f32 %v746_v9, %v660_v55 }
 0xf39   :  { %v750_v8 = vpop.permute.xlu0 %749 }
 0xf3a   :  { %v752_v10 = vmul.f32 %v750_v8, %v746_v9 }
 0xf3c   :  { %754 = vrot.lane.b32.xlu1 %v752_v10, %s1332_s9 }
 0xfae   :  { %v755_v12 = vpop.permute.xlu1 %754 }
 0xfaf   :  { %v757_v60 = vadd.f32 %v755_v12, %v747_v11 }
 0xfb1   :  { %1318 = vtanh.f32 %v757_v60 }
 0xfbb   :  { %v1319_v14 = vpop.eup %1318 }
 0xfbc   :  { %760 = vrot.lane.b32.xlu0 %v1319_v14, %s1331_s8 }
0x102e   :  { %v761_v15 = vpop.permute.xlu0 %760 }
0x102f   :  { %v763_v16 = vmul.f32 %v761_v15, %v746_v9 }
0x1031   :  { %765 = vrot.lane.b32.xlu1 %v763_v16, %s1332_s9 }
0x10a3   :  { %v766_v18 = vpop.permute.xlu1 %765 }
0x10a4   :  { %1209 = vmatmul.mubr.msk.f32.vlgmr.msra.gmra.mrb[12].mxu0 %vm183_vm2, %v766_v18 }
0x10a5   :  { %1230 = vmatprep.mubr.msk.f32.mxu0 %vm1329_vm1, %v1330_v4 }
0x1177   :  { %v835_v20 = vpop.f32.mrb[12].mxu0 }
0x1178   :  { %v839_v21 = vadd.f32 %v835_v20, %v175_v19  ;;  %v1210_v23 = vpop.f32.mrb[13].mxu0 }
0x117a   :  { %v840_v25 = vmul.f32 %v1411_v17, %v839_v21 }
0x117c   :  { %1320 = vtanh.f32 %v840_v25 }
0x1186   :  { %v1321_v26 = vpop.eup %1320 }
0x1187   :  { %v842_v27 = vmul.f32 %v1321_v26, %v1417_v22 }
0x1189   :  { %v843_v28 = vadd.f32 %v1422_v24, %v842_v27 }
0x118b   :  { %846 = vrot.lane.b32.xlu0 %v843_v28, %s1331_s8  ;;  %v844_v4 = vmul.f32 %v843_v28, %v757_v60 }
0x11fd   :  { %v847_v29 = vpop.permute.xlu0 %846 }
0x11fe   :  { %v849_v30 = vmul.f32 %v847_v29, %v843_v28 }
0x1200   :  { %851 = vrot.lane.b32.xlu1 %v849_v30, %s1332_s9 }
0x1272   :  { %v852_v31 = vpop.permute.xlu1 %851 }
0x1273   :  { %v854_v63 = vadd.f32 %v852_v31, %v844_v4 }
0x1275   :  { %1322 = vtanh.f32 %v854_v63 }
0x127f   :  { %v1323_v32 = vpop.eup %1322 }
0x1280   :  { %857 = vrot.lane.b32.xlu0 %v1323_v32, %s1331_s8 }
0x12f2   :  { %v858_v33 = vpop.permute.xlu0 %857 }
0x12f3   :  { %v860_v34 = vmul.f32 %v858_v33, %v843_v28 }
0x12f5   :  { %862 = vrot.lane.b32.xlu1 %v860_v34, %s1332_s9 }
0x1367   :  { %v863_v35 = vpop.permute.xlu1 %862 }
0x1368   :  { %1220 = vmatmul.mubr.msk.f32.vlgmr.msra.gmra.mrb[8].mxu1 %vm183_vm2, %v863_v35 }
0x143b   :  { %v932_v37 = vpop.f32.mrb[8].mxu1 }
0x143c   :  { %v936_v38 = vadd.f32 %v932_v37, %v180_v36  ;;  %v1221_v39 = vpop.f32.mrb[9].mxu1 }
0x143e   :  { %v937_v40 = vmul.f32 %v1411_v17, %v936_v38  ;;  %v21_v17 = vld [vmem:[%s1584_s2] sm:$0xff] }
0x1440   :  { %1324 = vtanh.f32 %v937_v40 }
0x144a   :  { %v1325_v41 = vpop.eup %1324 }
0x144b   :  { %v939_v42 = vmul.f32 %v1325_v41, %v1417_v22  ;;  %v22_v22 = vld [vmem:[%s1584_s2 + $0x8] sm:$0xff] }
0x144c   :  { %v1286_v62 = vpack.c.bf16 %v22_v22, %v21_v17 }
0x144d   :  { %v940_v43 = vadd.f32 %v1422_v24, %v939_v42  ;;  %v23_v24 = vld [vmem:[%s1584_s2 + $0x10] sm:$0xff] }
0x144e   :  { %1287 = vmatpush3.bf16.msra.mxu0 %v1286_v62  ;;  %v1289_v49 = vpack.c.bf16 %v24_v48, %v23_v24 }
0x144f   :  { %943 = vrot.lane.b32.xlu0 %v940_v43, %s1331_s8  ;;  %v941_v46 = vmul.f32 %v940_v43, %v854_v63  ;;  %1288 = vmatprep.subr.bf16.mxu0 %v1328_v0 }
0x1452   :  { %1290 = vmatpush3.bf16.msra.mxu0 %v1289_v49 }
0x14c1   :  { %v944_v44 = vpop.permute.xlu0 %943 }
0x14c2   :  { %v946_v45 = vmul.f32 %v944_v44, %v940_v43 }
0x14c4   :  { %948 = vrot.lane.b32.xlu1 %v946_v45, %s1332_s9 }
0x1536   :  { %v949_v47 = vpop.permute.xlu1 %948 }
0x1537   :  { %v951_v13 = vadd.f32 %v949_v47, %v941_v46 }
0x1539   :  { %1326 = vtanh.f32 %v951_v13 }
0x1543   :  { %v1327_v50 = vpop.eup %1326 }
0x1544   :  { %954 = vrot.lane.b32.xlu0 %v1327_v50, %s1331_s8 }
0x15b6   :  { %v955_v51 = vpop.permute.xlu0 %954 }
0x15b7   :  { %v957_v52 = vmul.f32 %v955_v51, %v940_v43 }
0x15b9   :  { %963 = vrot.lane.b32.xlu1 %v957_v52, %s1332_s9 }
0x162b   :  { %v964_v53 = vpop.permute.xlu1 %963 }
0x162c   :  { %1231 = vmatmul.mubr.msk.f32.vlgmr.msra.gmra.mrb[14].mxu0 %vm183_vm2, %v964_v53 }
0x16ff   :  { %v1033_v55 = vpop.f32.mrb[14].mxu0 }
0x1700   :  { %v1034_v56 = vadd.f32 %v1061_v54, %v1033_v55  ;;  %v1232_v57 = vpop.f32.mrb[15].mxu0 }
0x1702   :  { %1037 = vst [vmem:[%s1585_s3] sm:$0xff] %v1034_v56 }

</bundles_post_ra>
